<compile_context>
chip_gen: v7x
topology: tpu7x:2x2x1
jax: 0.10.0
libtpu: 0.0.40
codegen_flags: <defaults>
</compile_context>

<pallas_src>
import jax
import jax.numpy as jnp
from jax.experimental import pallas as pl
from jax.experimental.pallas import tpu as pltpu


_DEFAULT_ROW_TILE = 256     # Ti: sublane dim of the (Ti, Tj) pairwise tile
_DEFAULT_COL_TILE = 4096    # Tj: lane dim -- keep long / lane-dense
_SORT_PATH_MIN_N = 8192     # beyond this, O(N log N) rank path wins


def _round_up(x, m):
    return ((x + m - 1) // m) * m


def _auroc_kernel(p_pos_ref, p_neg_ref, out_ref, acc_ref):
    """One (Ti, Tj) tile of the pairwise Mann-Whitney sum.

    Grid is (row_tiles i, col_tiles j); j is the carried reduction axis.
    p_pos_ref: (Ti, 1) f32 preds, -inf where the row is not a positive sample
               (or padding) -> such rows contribute 0.
    p_neg_ref: (1, Tj) f32 preds, +inf where the column is not a negative
               sample (or padding) -> such columns contribute 0.
    acc_ref[r] accumulates sum_c (2*[p_r > p_c] + [p_r == p_c]).
    """
    j = pl.program_id(1)

    @pl.when(j == 0)
    def _():
        acc_ref[...] = jnp.zeros_like(acc_ref)

    p_pos = p_pos_ref[...]                       # (Ti, 1)
    p_neg = p_neg_ref[...]                       # (1, Tj)
    # 2*[>] + [==]  ==  [>] + [>=];  values {0,1,2} are exact in bf16.
    m = ((p_pos > p_neg).astype(jnp.bfloat16)
         + (p_pos >= p_neg).astype(jnp.bfloat16))           # (Ti, Tj) bf16
    # Row reduction on the otherwise-idle MXU, f32 accumulation (exact counts).
    ones = jnp.ones((p_neg.shape[1], 1), jnp.bfloat16)
    acc_ref[...] += jnp.dot(m, ones, preferred_element_type=jnp.float32)

    @pl.when(j == pl.num_programs(1) - 1)
    def _():
        # Collapse once per row tile (epilogue only).
        s = jnp.sum(acc_ref[...])
        out_ref[...] = jnp.full(out_ref.shape, s, dtype=jnp.float32)


def _vmem_budget_bytes(ti, tj):
    m_bytes = ti * tj * 4                         # bf16 m + compare temps (conservative)
    in_bytes = 2 * (ti * 128 * 4 + 8 * tj * 4)    # double-buffered, lane/sublane padded
    acc_bytes = ti * 128 * 4
    out_bytes = 2 * 8 * 128 * 4
    budget = 2 * m_bytes + in_bytes + acc_bytes + out_bytes + (4 << 20)
    return int(min(max(budget, 16 << 20), 32 << 20))   # <=32 MiB: safe on v7x 64 MiB


def _auroc_pairwise_pallas(p_pos, p_neg, row_tile, col_tile):
    """Raw weighted pair count (2*gt + eq over pos x neg pairs) via Pallas."""
    n = p_pos.shape[0]

    tj = min(_round_up(col_tile, 128), _round_up(n, 128))
    ti = min(_round_up(row_tile, 8), _round_up(n, 8))
    # Guarantee >= 2 row tiles when possible so both v7x TensorCores get work.
    if _round_up(n, ti) // ti < 2 and n > 8:
        ti = max(8, _round_up((n + 1) // 2, 8))

    n_rows = _round_up(n, ti)
    n_cols = _round_up(n, tj)

    # Padded rows -> -inf (contribute 0); padded cols -> +inf (contribute 0).
    p_pos_col = jnp.pad(p_pos, (0, n_rows - n),
                        constant_values=-jnp.inf).reshape(n_rows, 1)
    p_neg_row = jnp.pad(p_neg, (0, n_cols - n),
                        constant_values=jnp.inf).reshape(1, n_cols)

    n_row_tiles = n_rows // ti
    n_col_tiles = n_cols // tj

    partials = pl.pallas_call(
        _auroc_kernel,
        out_shape=jax.ShapeDtypeStruct((n_row_tiles, 8, 128), jnp.float32),
        grid_spec=pltpu.PrefetchScalarGridSpec(
            num_scalar_prefetch=0,
            grid=(n_row_tiles, n_col_tiles),
            in_specs=[
                pl.BlockSpec((ti, 1), lambda i, j: (i, 0)),   # pos-masked preds (rows)
                pl.BlockSpec((1, tj), lambda i, j: (0, j)),   # neg-masked preds (cols)
            ],
            out_specs=pl.BlockSpec((1, 8, 128), lambda i, j: (i, 0, 0)),
            scratch_shapes=[pltpu.VMEM((ti, 1), jnp.float32)],
        ),
        compiler_params=pltpu.CompilerParams(
            dimension_semantics=("parallel", "arbitrary"),
            vmem_limit_bytes=_vmem_budget_bytes(ti, tj),
        ),
    )(p_pos_col, p_neg_row)

    # Kernel computed 2*[>] + [==]; apply the 0.5 once to the final scalar.
    return 0.5 * jnp.sum(partials[:, 0, 0])


def _auroc_rank_based(preds, pos, neg):
    """O(N log N) Mann-Whitney via average ranks (large-N path, pure JAX)."""
    n_pos = jnp.sum(pos)
    n_neg = jnp.sum(neg)
    sorted_p = jnp.sort(preds)
    lo = jnp.searchsorted(sorted_p, preds, side="left").astype(jnp.float32)
    hi = jnp.searchsorted(sorted_p, preds, side="right").astype(jnp.float32)
    ranks = 0.5 * (lo + hi + 1.0)                # average 1-based rank (ties)
    rank_sum_pos = jnp.sum(ranks * pos)
    denom = n_pos * n_neg
    return jnp.where(
        denom > 0,
        (rank_sum_pos - 0.5 * n_pos * (n_pos + 1.0)) / jnp.maximum(denom, 1.0),
        jnp.float32(0.0),
    )


def auroc_binary(preds, target, *,
                 row_tile=_DEFAULT_ROW_TILE, col_tile=_DEFAULT_COL_TILE):
    """Binary AUROC matching torchmetrics.AUROC(task='binary') on one call."""
    preds = jnp.asarray(preds, jnp.float32).reshape(-1)
    target = jnp.asarray(target).astype(jnp.int32).reshape(-1)   # target.int()

    # torchmetrics: sigmoid only if preds fall outside [0, 1].
    in_unit = jnp.all((preds >= 0.0) & (preds <= 1.0))
    preds = jnp.where(in_unit, preds, jax.nn.sigmoid(preds))

    pos = (target == 1)
    neg = (target == 0)
    n_pos = jnp.sum(pos.astype(jnp.float32))
    n_neg = jnp.sum(neg.astype(jnp.float32))

    n = preds.shape[0]
    if n >= _SORT_PATH_MIN_N:
        # Algorithmic fix at large N: O(N^2) pairwise is the wrong tool.
        return _auroc_rank_based(preds,
                                 pos.astype(jnp.float32),
                                 neg.astype(jnp.float32))

    # Fold the class masks into the preds: only (pos row, neg col) pairs can
    # produce a nonzero comparison against +-inf sentinels.
    p_pos = jnp.where(pos, preds, -jnp.inf)
    p_neg = jnp.where(neg, preds, jnp.inf)

    pair_sum = _auroc_pairwise_pallas(p_pos, p_neg, row_tile, col_tile)
    denom = n_pos * n_neg
    # TODO(synk): torchmetrics warns when a class is missing; we return 0.0.
    return jnp.where(denom > 0, pair_sum / jnp.maximum(denom, 1.0),
                     jnp.float32(0.0))


def _auroc_reference(preds, target):
    """Pure-JAX O(N^2) pairwise reference (ties weighted 0.5)."""
    preds = jnp.asarray(preds, jnp.float32).reshape(-1)
    target = jnp.asarray(target).astype(jnp.int32).reshape(-1)
    in_unit = jnp.all((preds >= 0.0) & (preds <= 1.0))
    preds = jnp.where(in_unit, preds, jax.nn.sigmoid(preds))
    pos = (target == 1).astype(jnp.float32)
    neg = (target == 0).astype(jnp.float32)
    gt = (preds[:, None] > preds[None, :]).astype(jnp.float32)
    eq = (preds[:, None] == preds[None, :]).astype(jnp.float32)
    s = jnp.sum((gt + 0.5 * eq) * pos[:, None] * neg[None, :])
    return s / (jnp.sum(pos) * jnp.sum(neg))


if __name__ == "__main__":
    key = jax.random.PRNGKey(0)
    k1, k2 = jax.random.split(key)

    # Case 1: default tiles (N = 256, logits so the sigmoid branch runs).
    # Row tile auto-shrinks to 128 so the i axis has 2 tiles (v7x megacore).
    N = 256
    preds = jax.random.normal(k1, (N,), dtype=jnp.float32) * 2.0
    target = (jax.random.uniform(k2, (N,)) > 0.5).astype(jnp.int32)

    out = jax.block_until_ready(auroc_binary(preds, target))
    ref = jax.block_until_ready(_auroc_reference(preds, target))
    assert out.shape == () and out.dtype == jnp.float32
    assert abs(float(out) - float(ref)) < 1e-5, (float(out), float(ref))

    # Case 2: multi-tile grid with a padded tail (N = 300, 64x128 tiles):
    # exercises the j-axis accumulator, per-row-tile partials and inf-padding.
    k3, k4 = jax.random.split(k2)
    N2 = 300
    preds2 = jax.random.normal(k3, (N2,), dtype=jnp.float32) * 2.0
    target2 = (jax.random.uniform(k4, (N2,)) > 0.5).astype(jnp.int32)

    out2 = jax.block_until_ready(
        auroc_binary(preds2, target2, row_tile=64, col_tile=128))
    ref2 = jax.block_until_ready(_auroc_reference(preds2, target2))
    assert abs(float(out2) - float(ref2)) < 1e-5, (float(out2), float(ref2))

    print("KERNEL_OK")
</pallas_src>

<mosaic_0001>
module attributes {stable_mosaic.version = 11 : i64} {
  func.func @_auroc_kernel(%arg0: i32, %arg1: i32, %arg2: memref<128x1xf32, #tpu.memory_space<vmem>>, %arg3: memref<1x256xf32, #tpu.memory_space<vmem>>, %arg4: memref<1x8x128xf32, #tpu.memory_space<vmem>>, %arg5: memref<128x1xf32, #tpu.memory_space<vmem>>) attributes {dimension_semantics = [#tpu.dimension_semantics<parallel>, #tpu.dimension_semantics<arbitrary>], iteration_bounds = array<i64: 2, 1>, scalar_prefetch = 0 : i64, scratch_operands = 1 : i64, tpu.core_type = #tpu.core_type<tc>, window_params = [{transform_indices = @transform_0, window_bounds = array<i64: 128, 1>}, {transform_indices = @transform_1, window_bounds = array<i64: 1, 256>}, {transform_indices = @transform_2, window_bounds = array<i64: 1, 8, 128>}]} {
    %c0_i32 = arith.constant 0 : i32
    %0 = arith.cmpi eq, %arg1, %c0_i32 : i32
    %1 = arith.extui %0 : i1 to i32
    %c0_i32_0 = arith.constant 0 : i32
    %2 = arith.cmpi ne, %1, %c0_i32_0 : i32
    scf.if %2 {
      %cst_11 = arith.constant 0.000000e+00 : f32
      %26 = vector.broadcast %cst_11 : f32 to vector<128x1xf32>
      %c0_12 = arith.constant 0 : index
      %c0_13 = arith.constant 0 : index
      %27 = vector.load %arg5[%c0_12, %c0_13] : memref<128x1xf32, #tpu.memory_space<vmem>>, vector<128x1xf32>
      tpu.vector_store %arg5[%c0_12, %c0_13], %26 {strides = array<i32>} : memref<128x1xf32, #tpu.memory_space<vmem>>, vector<128x1xf32>,
    } else {
    }
    %c0 = arith.constant 0 : index
    %c0_1 = arith.constant 0 : index
    %3 = vector.load %arg2[%c0, %c0_1] : memref<128x1xf32, #tpu.memory_space<vmem>>, vector<128x1xf32>
    %c0_2 = arith.constant 0 : index
    %c0_3 = arith.constant 0 : index
    %4 = vector.load %arg3[%c0_2, %c0_3] : memref<1x256xf32, #tpu.memory_space<vmem>>, vector<1x256xf32>
    %5 = vector.broadcast %3 : vector<128x1xf32> to vector<128x256xf32>
    %6 = vector.broadcast %4 : vector<1x256xf32> to vector<128x256xf32>
    %7 = arith.cmpf ogt, %5, %6 : vector<128x256xf32>
    %8 = arith.extui %7 : vector<128x256xi1> to vector<128x256xi32>
    %9 = arith.sitofp %8 : vector<128x256xi32> to vector<128x256xf32>
    %10 = arith.truncf %9 : vector<128x256xf32> to vector<128x256xbf16>
    %11 = vector.broadcast %3 : vector<128x1xf32> to vector<128x256xf32>
    %12 = vector.broadcast %4 : vector<1x256xf32> to vector<128x256xf32>
    %13 = arith.cmpf oge, %11, %12 : vector<128x256xf32>
    %14 = arith.extui %13 : vector<128x256xi1> to vector<128x256xi32>
    %15 = arith.sitofp %14 : vector<128x256xi32> to vector<128x256xf32>
    %16 = arith.truncf %15 : vector<128x256xf32> to vector<128x256xbf16>
    %17 = arith.addf %10, %16 : vector<128x256xbf16>
    %cst = arith.constant 1.000000e+00 : bf16
    %18 = vector.broadcast %cst : bf16 to vector<256x1xbf16>
    %c0_4 = arith.constant 0 : index
    %c0_5 = arith.constant 0 : index
    %19 = vector.load %arg5[%c0_4, %c0_5] : memref<128x1xf32, #tpu.memory_space<vmem>>, vector<128x1xf32>
    %cst_6 = arith.constant dense<0.000000e+00> : vector<128x1xf32>
    %20 = tpu.matmul %17, %18, %cst_6 {dimension_numbers = #tpu.dot_dimension_numbers<[1], [0], [0], [1], [0, 0, 1, 1], [], []>} : vector<128x256xbf16>, vector<256x1xbf16>, vector<128x1xf32> -> vector<128x1xf32>
    %21 = arith.addf %19, %20 : vector<128x1xf32>
    %c0_7 = arith.constant 0 : index
    %c0_8 = arith.constant 0 : index
    %22 = vector.load %arg5[%c0_7, %c0_8] : memref<128x1xf32, #tpu.memory_space<vmem>>, vector<128x1xf32>
    tpu.vector_store %arg5[%c0_7, %c0_8], %21 {strides = array<i32>} : memref<128x1xf32, #tpu.memory_space<vmem>>, vector<128x1xf32>,
    %c0_i32_9 = arith.constant 0 : i32
    %23 = arith.cmpi eq, %arg1, %c0_i32_9 : i32
    %24 = arith.extui %23 : i1 to i32
    %c0_i32_10 = arith.constant 0 : i32
    %25 = arith.cmpi ne, %24, %c0_i32_10 : i32
    scf.if %25 {
      %c0_11 = arith.constant 0 : index
      %c0_12 = arith.constant 0 : index
      %26 = vector.load %arg5[%c0_11, %c0_12] : memref<128x1xf32, #tpu.memory_space<vmem>>, vector<128x1xf32>
      %27 = vector.shape_cast %26 : vector<128x1xf32> to vector<1x128x1xf32>
      %cst_13 = arith.constant dense<0.000000e+00> : vector<1xf32>
      %28 = vector.multi_reduction <add>, %27, %cst_13 [1, 2] : vector<1x128x1xf32> to vector<1xf32>
      %29 = vector.shape_cast %28 : vector<1xf32> to vector<1x1x1xf32>
      %30 = vector.extract %29[0, 0, 0] : f32 from vector<1x1x1xf32>
      %31 = vector.broadcast %30 : f32 to vector<1x8x128xf32>
      %c0_14 = arith.constant 0 : index
      %c0_15 = arith.constant 0 : index
      %c0_16 = arith.constant 0 : index
      %32 = vector.load %arg4[%c0_14, %c0_15, %c0_16] : memref<1x8x128xf32, #tpu.memory_space<vmem>>, vector<1x8x128xf32>
      tpu.vector_store %arg4[%c0_14, %c0_15, %c0_16], %31 {strides = array<i32>} : memref<1x8x128xf32, #tpu.memory_space<vmem>>, vector<1x8x128xf32>,
    } else {
    }
    return
  }
  func.func @transform_0(%arg0: i32, %arg1: i32) -> (i32, i32) {
    %c0_i32 = arith.constant 0 : i32
    %c0_i32_0 = arith.constant 0 : i32
    return %arg0, %c0_i32 : i32, i32
  }
  func.func @transform_1(%arg0: i32, %arg1: i32) -> (i32, i32) {
    %c0_i32 = arith.constant 0 : i32
    %c0_i32_0 = arith.constant 0 : i32
    return %c0_i32, %arg1 : i32, i32
  }
  func.func @transform_2(%arg0: i32, %arg1: i32) -> (i32, i32, i32) {
    %c0_i32 = arith.constant 0 : i32
    %c0_i32_0 = arith.constant 0 : i32
    %c0_i32_1 = arith.constant 0 : i32
    return %arg0, %c0_i32, %c0_i32_0 : i32, i32, i32
  }
}

</mosaic_0001>

<bundles_post_ra>
// kernel: tpu_custom_call.1
= control target key start
LH: loop header
LB: loop body
LE: loop exit
PB: predicated region body
PF: predicated region fallthrough
CT: control target
= control target key end

     0   :  { %7 = vsyncpa [#allocation4], 0  ;;  %s1587_s0 = inlined_call_operand.vmem [shape: f32[256,1], index: 0, kind: input, shape index: {}]   ;;  %s1588_s1 = inlined_call_operand.vmem [shape: f32[1,256], index: 1, kind: input, shape index: {}]   ;;  %s1589_s2 = inlined_call_operand.hbm [shape: f32[2,8,128], index: 2, kind: output, shape index: {}]  }
   0x1   :  { %9 = vsyncpa [#allocation4 + $0x1], 0  ;;  %s1164_s9 = smov 0   ;;  %s1166_s10 = smov 0  }
   0x2   :  { %s1168_s11 = smov 0   ;;  %s1170_s12 = smov 0  }
   0x3   :  { %s1172_s13 = smov 0   ;;  %s1174_s14 = smov 0  }
   0x4 LB: > { %s846_s15 = sadd.s32 4294967295, %s1143_s14   ;;  %s847_s16 = sadd.s32 4294967294, %s1143_s14   ;;  %s1143_s14 = sphi %s1174_s14, %s15_s14   ;;  %s1139_s13 = sphi %s1172_s13, %s1596_s13   ;;  %s1135_s12 = sphi %s1170_s12, %s1595_s12   ;;  %s1131_s11 = sphi %s1168_s11, %s1594_s11   ;;  %s1127_s10 = sphi %s1166_s10, %s1593_s10   ;;  %s1123_s9 = sphi %s1164_s9, %s1592_s9  }
   0x5   : > { %s27_s17 = sadd.s32 1, %s1139_s13  ;;  %s86_s18 = sadd.s32 1, %s1131_s11 }
   0x6   : > { %p29_p0 = scmp.ge.s32.totalorder %s27_s17, 2  ;;  %p96_p1 = scmp.ne.s32.totalorder %s1131_s11, %s1127_s10 }
   0x7   : > { %p97_p2 = scmp.eq.s32.totalorder %s846_s15, 1  ;;  %p102_p3 = scmp.ne.s32.totalorder %s1127_s10, %s1123_s9 }
   0x8   : > { %s1598_s17 = smov (%p29_p0, %s27_s17), 0  ;;  %p103_p5 = scmp.eq.s32.totalorder %s847_s16, 1 }
   0x9   : > { %p1204_p4 = por %p97_p2, %p96_p1  ;;  %s83_s20 = ssub.s32 %s1139_s13, %s1598_s17 }
   0xa   : > { %p851_p6 = scmp.ge.s32.totalorder %s1143_s14, 1  ;;  %p84_p7 = scmp.eq.s32.totalorder %s83_s20, 0 }
   0xb   : > { %p1211_p8 = por %p103_p5, %p102_p3  ;;  %p138_p9 = scmp.lt.s32.totalorder %s1143_s14, 3 }
   0xc   : > { %s1217_s22 = scalar_select %p84_p7, %s1131_s11, %s86_s18  }
   0xd   : > { %p139_p10 = pnand %p851_p6, %p138_p9 }
   0xe   : > { %s853_s23 = sshll.u32 (!%p139_p10), %s1135_s12, 4  ;;  %v1145_v0 = vmov (!%p139_p10), 0   ;;  %v1146_v1 = vmov (!%p139_p10), 1065369472   ;;  %v296_v18 = vlaneseq (!%p139_p10)  ;;  %v214_v21 = vld [vmem:[%s1588_s1] sm:$0x3] (!%p139_p10) }
   0xf   : > { %142 = sbr.rel (%p139_p10) target bundleno = 665 (0x299), region = 28  ;;  %1064 = vset.pattern.permute.xlu1 (!%p139_p10), %v1145_v0  ;;  %1063 = vset.pattern.permute.xlu0 (!%p139_p10), %v1145_v0  ;;  %p165_p11 = scmp.lt.s32.totalorder (!%p139_p10), %s853_s23, 31  ;;  %v1147_v29 = vmov (!%p139_p10), 0.0  }
  0x10   : > { %923 = vmatprep.subr.bf16.mxu0 (!%p139_p10), %v1146_v1  ;;  %987 = vmatprep.subr.bf16.mxu1 (!%p139_p10), %v1146_v1  ;;  %v297_v19 = vshrl.u32 (!%p139_p10), %v296_v18, 7  ;;  %s161_s30 = sand.u32 (!%p139_p10), 1, %s1127_s10   ;;  %s920_s6 = sshll.u32 (!%p139_p10), %s1135_s12, 7 }
  0x11   : > { %924 = vmatpush3.bf16.msra.mxu0 (!%p139_p10), %v1146_v1  ;;  %995 = vmatpush3.bf16.msra.mxu1 (!%p139_p10), %v1146_v1  ;;  %s852_s3 = sshll.u32 (!%p139_p10), %s161_s30, 3  ;;  %s1542_s16 = scalar_lea.hbm (!%p139_p10), %s1589_s2, %s920_s6 }
  0x12   : > { %925 = vmatprep.subr.bf16.mxu0 (!%p139_p10), %v1146_v1  ;;  %988 = vmatprep.subr.bf16.mxu1 (!%p139_p10), %v1146_v1  ;;  %v298_v20 = vsub.s32 (!%p139_p10), 0, %v297_v19  ;;  %v302_v22 = vsub.s32 (!%p139_p10), 1, %v297_v19  ;;  %s163_s4 = scalar_lea.vmem (!%p139_p10), [#allocation3], %s852_s3  ;;  %s754_s18 = scalar_lea.sflag (!%p139_p10), [#allocation4], %s161_s30 }
  0x13   : > { %s767_s5 = sshll.u32 (!%p139_p10), %s163_s4, 4  ;;  %s1148_s12 = smov (!%p139_p10), [#allocation3]   ;;  %s1537_s5 = int_to_ptr.vmem [resolvable:$true] %s767_s5 }
  0x14   : > { %v1244_v23 = vrot.slane (!%p139_p10), %v214_v21, %v298_v20  ;;  %v1246_v24 = vrot.slane (!%p139_p10), %v214_v21, %v302_v22  ;;  %s1065_s20 = scalar_lea.vmem (!%p139_p10), %s1537_s5, 128 }
  0x15   : > { %926 = vmatpush3.bf16.msra.mxu0 (!%p139_p10), %v1146_v1  ;;  %996 = vmatpush3.bf16.msra.mxu1 (!%p139_p10), %v1146_v1  ;;  %p1066_p12 = scmp.ne.s32.totalorder (!%p139_p10), %s1537_s5, %s1065_s20 }
  0x16   : > { %s1600_s23 = smov (!%p165_p11, %s853_s23), 31  ;;  %927 = vmatprep.subr.bf16.mxu0 %v1146_v1  ;;  %989 = vmatprep.subr.bf16.mxu1 %v1146_v1 }
  0x17   : > { %s854_s24 = sshll.u32 %s1600_s23, 3  ;;  %p1067_p13 = pnand %p1066_p12, %p1204_p4 }
  0x18   : > { %s1223_s27 = scalar_lea.vmem %s1587_s0, %s854_s24  ;;  %s1069_s23 = sshll.u32 %s1148_s12, 4  ;;  %s1070_s23 = int_to_ptr.vmem [resolvable:$false] %s1069_s23 }
  0x19   : > { %v200_v2 = vld [vmem:[%s1223_s27 + $0x10] sm:$0xff]  ;;  %v198_v3 = vld [vmem:[%s1223_s27] sm:$0xff]  ;;  %v201_v4 = vld [vmem:[%s1223_s27 + $0x18] sm:$0xff]  ;;  %928 = vmatpush3.bf16.msra.mxu0 %v1146_v1  ;;  %997 = vmatpush3.bf16.msra.mxu1 %v1146_v1  ;;  %p1068_p0 = pneg %p1067_p13  ;;  %s1071_s24 = scalar_lea.vmem %s1070_s23, 256 }
  0x1a   : > { %227 = vperm.xlu1 %1064, %v200_v2   ;;  %217 = vperm.xlu0 %1063, %v198_v3   ;;  %v199_v5 = vld [vmem:[%s1223_s27 + $0x8] sm:$0xff]  ;;  %v202_v7 = vld [vmem:[%s1223_s27 + $0x20] sm:$0xff]  ;;  %v205_v10 = vld [vmem:[%s1223_s27 + $0x38] sm:$0xff]  ;;  %p1072_p1 = scmp.lt.s32.totalorder %s1537_s5, %s1070_s23  ;;  %p1073_p2 = scmp.lt.s32.totalorder %s1071_s24, %s1065_s20 }
  0x1b   : > { %v203_v6 = vld [vmem:[%s1223_s27 + $0x28] sm:$0xff]  ;;  %929 = vmatprep.subr.bf16.mxu0 %v1146_v1  ;;  %990 = vmatprep.subr.bf16.mxu1 %v1146_v1  ;;  %v206_v9 = vld [vmem:[%s1223_s27 + $0x40] sm:$0xff]  ;;  %v204_v11 = vld [vmem:[%s1223_s27 + $0x30] sm:$0xff] }
  0x1c   : > { %v207_v8 = vld [vmem:[%s1223_s27 + $0x48] sm:$0xff]  ;;  %v209_v12 = vld [vmem:[%s1223_s27 + $0x58] sm:$0xff]  ;;  %v208_v13 = vld [vmem:[%s1223_s27 + $0x50] sm:$0xff]  ;;  %p1074_p3 = por %p1073_p2, %p1072_p1 }
  0x1d   : > { %930 = vmatpush3.bf16.msra.mxu0 %v1146_v1  ;;  %998 = vmatpush3.bf16.msra.mxu1 %v1146_v1  ;;  %v211_v14 = vld [vmem:[%s1223_s27 + $0x68] sm:$0xff]  ;;  %v210_v15 = vld [vmem:[%s1223_s27 + $0x60] sm:$0xff]  ;;  %v213_v16 = vld [vmem:[%s1223_s27 + $0x78] sm:$0xff] }
  0x1e   : > { %232 = vperm.xlu1 %1064, %v201_v4   ;;  %222 = vperm.xlu0 %1063, %v199_v5   ;;  %v212_v17 = vld [vmem:[%s1223_s27 + $0x70] sm:$0xff]  ;;  %p1075_p5 = pnand %p1074_p3, %p1068_p0 }
  0x1f   : > { %931 = vmatprep.subr.bf16.mxu0 %v1146_v1  ;;  %991 = vmatprep.subr.bf16.mxu1 %v1146_v1 }
  0x21   : > { %932 = vmatpush3.bf16.msra.mxu0 %v1146_v1  ;;  %999 = vmatpush3.bf16.msra.mxu1 %v1146_v1 }
  0x22   : > { %242 = vperm.xlu1 %1064, %v203_v6   ;;  %237 = vperm.xlu0 %1063, %v202_v7  }
  0x23   : > { %933 = vmatprep.subr.bf16.mxu0 %v1146_v1  ;;  %992 = vmatprep.subr.bf16.mxu1 %v1146_v1 }
  0x25   : > { %934 = vmatpush3.bf16.msra.mxu0 %v1146_v1  ;;  %1000 = vmatpush3.bf16.msra.mxu1 %v1146_v1 }
  0x26   : > { %262 = vperm.xlu1 %1064, %v207_v8   ;;  %257 = vperm.xlu0 %1063, %v206_v9  }
  0x27   : > { %935 = vmatprep.subr.bf16.mxu0 %v1146_v1  ;;  %993 = vmatprep.subr.bf16.mxu1 %v1146_v1 }
  0x29   : > { %936 = vmatpush3.bf16.msra.mxu0 %v1146_v1  ;;  %1001 = vmatpush3.bf16.msra.mxu1 %v1146_v1 }
  0x2a   : > { %252 = vperm.xlu1 %1064, %v205_v10   ;;  %247 = vperm.xlu0 %1063, %v204_v11  }
  0x2b   : > { %937 = vmatprep.subr.bf16.mxu0 %v1146_v1  ;;  %994 = vmatprep.subr.bf16.mxu1 %v1146_v1 }
  0x2d   : > { %938 = vmatpush3.bf16.msra.mxu0 %v1146_v1  ;;  %1002 = vmatpush3.bf16.msra.mxu1 %v1146_v1 }
  0x2e   : > { %272 = vperm.xlu1 %1064, %v209_v12   ;;  %267 = vperm.xlu0 %1063, %v208_v13  }
  0x32   : > { %282 = vperm.xlu1 %1064, %v211_v14   ;;  %277 = vperm.xlu0 %1063, %v210_v15  }
  0x36   : > { %292 = vperm.xlu1 %1064, %v213_v16   ;;  %287 = vperm.xlu0 %1063, %v212_v17  }
  0x99   : > { %v228_v25 = vpop.permute.xlu1 %227  ;;  %v218_v26 = vpop.permute.xlu0 %217 }
  0x9a   : > { %vm310_vm0 = vcmp.gt.f32.partialorder %v228_v25, %v1244_v23  ;;  %vm311_vm1 = vcmp.gt.f32.partialorder %v228_v25, %v1246_v24  ;;  %vm422_vm2 = vcmp.ge.f32.partialorder %v228_v25, %v1244_v23  ;;  %vm423_vm3 = vcmp.ge.f32.partialorder %v228_v25, %v1246_v24 }
  0x9b   : > { %vm306_vm4 = vcmp.gt.f32.partialorder %v218_v26, %v1244_v23  ;;  %vm418_vm5 = vcmp.ge.f32.partialorder %v218_v26, %v1244_v23  ;;  %v1255_v30 = vsel %vm310_vm0, 1.0, %v1147_v29  ;;  %v1258_v31 = vsel %vm311_vm1, 1.0, %v1147_v29 }
  0x9c   : > { %v1261_v32 = vsel %vm422_vm2, 1.0, %v1147_v29  ;;  %v892_v33 = vsel %vm423_vm3, 1.0, %v1147_v29  ;;  %v855_v34 = vsel %vm306_vm4, 1.0, %v1147_v29  ;;  %v887_v35 = vsel %vm418_vm5, 1.0, %v1147_v29 }
  0x9d   : > { %v233_v27 = vpop.permute.xlu1 %232  ;;  %v223_v28 = vpop.permute.xlu0 %222  ;;  %vm307_vm6 = vcmp.gt.f32.partialorder %v218_v26, %v1246_v24  ;;  %vm419_vm7 = vcmp.ge.f32.partialorder %v218_v26, %v1246_v24 }
  0x9e   : > { %vm312_vm8 = vcmp.gt.f32.partialorder %v233_v27, %v1244_v23  ;;  %vm313_vm9 = vcmp.gt.f32.partialorder %v233_v27, %v1246_v24  ;;  %vm309_vm10 = vcmp.gt.f32.partialorder %v223_v28, %v1246_v24  ;;  %vm421_vm11 = vcmp.ge.f32.partialorder %v223_v28, %v1246_v24 }
  0x9f   : > { %vm424_vm12 = vcmp.ge.f32.partialorder %v233_v27, %v1244_v23  ;;  %vm425_vm13 = vcmp.ge.f32.partialorder %v233_v27, %v1246_v24  ;;  %vm308_vm14 = vcmp.gt.f32.partialorder %v223_v28, %v1244_v23  ;;  %vm420_vm15 = vcmp.ge.f32.partialorder %v223_v28, %v1244_v23 }
  0xa0   : > { %v856_v38 = vsel %vm307_vm6, 1.0, %v1147_v29  ;;  %v888_v39 = vsel %vm419_vm7, 1.0, %v1147_v29  ;;  %v1281_v40 = vsel %vm312_vm8, 1.0, %v1147_v29  ;;  %v862_v41 = vsel %vm313_vm9, 1.0, %v1147_v29 }
  0xa1   : > { %v243_v36 = vpop.permute.xlu1 %242  ;;  %v238_v37 = vpop.permute.xlu0 %237  ;;  %v858_v42 = vsel %vm309_vm10, 1.0, %v1147_v29  ;;  %v890_v43 = vsel %vm421_vm11, 1.0, %v1147_v29  ;;  %v1287_v44 = vsel %vm424_vm12, 1.0, %v1147_v29  ;;  %v894_v45 = vsel %vm425_vm13, 1.0, %v1147_v29 }
  0xa2   : > { %vm316_vm0 = vcmp.gt.f32.partialorder %v243_v36, %v1244_v23  ;;  %vm317_vm1 = vcmp.gt.f32.partialorder %v243_v36, %v1246_v24  ;;  %v857_v46 = vsel %vm308_vm14, 1.0, %v1147_v29  ;;  %v889_v47 = vsel %vm420_vm15, 1.0, %v1147_v29 }
  0xa3   : > { %v1293_v48 = vsel %vm316_vm0, 1.0, %v1147_v29  ;;  %v1296_v49 = vsel %vm317_vm1, 1.0, %v1147_v29  ;;  %vm428_vm2 = vcmp.ge.f32.partialorder %v243_v36, %v1244_v23  ;;  %vm429_vm3 = vcmp.ge.f32.partialorder %v243_v36, %v1246_v24 }
  0xa4   : > { %vm314_vm4 = vcmp.gt.f32.partialorder %v238_v37, %v1244_v23  ;;  %vm315_vm5 = vcmp.gt.f32.partialorder %v238_v37, %v1246_v24  ;;  %v403_v52 = vpack.c.bf16 %v858_v42, %v856_v38  ;;  %v515_v53 = vpack.c.bf16 %v890_v43, %v888_v39 }
  0xa5   : > { %v263_v50 = vpop.permute.xlu1 %262  ;;  %v258_v51 = vpop.permute.xlu0 %257  ;;  %vm426_vm6 = vcmp.ge.f32.partialorder %v238_v37, %v1244_v23  ;;  %vm427_vm7 = vcmp.ge.f32.partialorder %v238_v37, %v1246_v24  ;;  %v402_v54 = vpack.c.bf16 %v857_v46, %v855_v34  ;;  %v514_v55 = vpack.c.bf16 %v889_v47, %v887_v35 }
  0xa6   : > { %v531_v56 = vadd.bf16 %v515_v53, %v403_v52  ;;  %vm324_vm8 = vcmp.gt.f32.partialorder %v263_v50, %v1244_v23  ;;  %vm436_vm9 = vcmp.ge.f32.partialorder %v263_v50, %v1244_v23  ;;  %v405_v57 = vpack.c.bf16 %v862_v41, %v1258_v31 }
  0xa7   : > { %v530_v58 = vadd.bf16 %v514_v55, %v402_v54  ;;  %vm322_vm10 = vcmp.gt.f32.partialorder %v258_v51, %v1244_v23  ;;  %vm434_vm11 = vcmp.ge.f32.partialorder %v258_v51, %v1244_v23  ;;  %v517_v59 = vpack.c.bf16 %v894_v45, %v892_v33 }
  0xa8   : > { %v1312_v61 = vsel %vm428_vm2, 1.0, %v1147_v29  ;;  %v1317_v62 = vsel %vm429_vm3, 1.0, %v1147_v29  ;;  %v1322_v63 = vsel %vm314_vm4, 1.0, %v1147_v29  ;;  %594 = vmatprep.mubr.bf16.mxu0 %v531_v56  ;;  %v1330_v1 = vsel %vm315_vm5, 1.0, %v1147_v29 }
  0xa9   : > { %v253_v60 = vpop.permute.xlu1 %252  ;;  %v1325_v0 = vpop.permute.xlu0 %247  ;;  %v1335_v2 = vsel %vm426_vm6, 1.0, %v1147_v29  ;;  %v896_v3 = vsel %vm427_vm7, 1.0, %v1147_v29  ;;  %595 = vmatmul.mubr.bf16.vlgmr.msra.gmra.mrb[0].mxu0 %v530_v58  ;;  %v533_v4 = vadd.bf16 %v517_v59, %v405_v57  ;;  %v873_v5 = vsel %vm324_vm8, 1.0, %v1147_v29 }
  0xaa   : > { %vm320_vm12 = vcmp.gt.f32.partialorder %v253_v60, %v1244_v23  ;;  %v905_v6 = vsel %vm436_vm9, 1.0, %v1147_v29  ;;  %v871_v7 = vsel %vm322_vm10, 1.0, %v1147_v29  ;;  %v903_v8 = vsel %vm434_vm11, 1.0, %v1147_v29 }
  0xab   : > { %602 = vmatprep.mubr.bf16.mxu0 %v533_v4  ;;  %vm321_vm13 = vcmp.gt.f32.partialorder %v253_v60, %v1246_v24  ;;  %v1354_v9 = vsel %vm320_vm12, 1.0, %v1147_v29  ;;  %vm432_vm14 = vcmp.ge.f32.partialorder %v253_v60, %v1244_v23  ;;  %vm433_vm15 = vcmp.ge.f32.partialorder %v253_v60, %v1246_v24 }
  0xac   : > { %vm318_vm0 = vcmp.gt.f32.partialorder %v1325_v0, %v1244_v23  ;;  %vm323_vm1 = vcmp.gt.f32.partialorder %v258_v51, %v1246_v24  ;;  %vm325_vm2 = vcmp.gt.f32.partialorder %v263_v50, %v1246_v24  ;;  %vm435_vm3 = vcmp.ge.f32.partialorder %v258_v51, %v1246_v24 }
  0xad   : > { %v273_v10 = vpop.permute.xlu1 %272  ;;  %v872_v11 = vsel %vm323_vm1, 1.0, %v1147_v29  ;;  %v874_v12 = vsel %vm325_vm2, 1.0, %v1147_v29  ;;  %vm437_vm4 = vcmp.ge.f32.partialorder %v263_v50, %v1246_v24  ;;  %v904_v13 = vsel %vm435_vm3, 1.0, %v1147_v29  ;;  %v268_v18 = vpop.permute.xlu0 %267 }
  0xae   : > { %v1368_v14 = vsel %vm321_vm13, 1.0, %v1147_v29  ;;  %v1371_v15 = vsel %vm432_vm14, 1.0, %v1147_v29  ;;  %v411_v16 = vpack.c.bf16 %v874_v12, %v872_v11  ;;  %v906_v17 = vsel %vm437_vm4, 1.0, %v1147_v29 }
  0xaf   : > { %v1375_v19 = vsel %vm433_vm15, 1.0, %v1147_v29  ;;  %vm319_vm5 = vcmp.gt.f32.partialorder %v1325_v0, %v1246_v24  ;;  %vm430_vm6 = vcmp.ge.f32.partialorder %v1325_v0, %v1244_v23  ;;  %v523_v20 = vpack.c.bf16 %v906_v17, %v904_v13 }
  0xb0   : > { %v1385_v21 = vsel %vm318_vm0, 1.0, %v1147_v29  ;;  %vm329_vm7 = vcmp.gt.f32.partialorder %v273_v10, %v1246_v24  ;;  %v404_v22 = vpack.c.bf16 %v1281_v40, %v1255_v30  ;;  %v516_v25 = vpack.c.bf16 %v1287_v44, %v1261_v32 }
  0xb1   : > { %v539_v26 = vadd.bf16 %v523_v20, %v411_v16  ;;  %vm441_vm8 = vcmp.ge.f32.partialorder %v273_v10, %v1246_v24  ;;  %v410_v27 = vpack.c.bf16 %v873_v5, %v871_v7  ;;  %v522_v28 = vpack.c.bf16 %v905_v6, %v903_v8  ;;  %v283_v34 = vpop.permute.xlu1 %282  ;;  %v278_v38 = vpop.permute.xlu0 %277 }
  0xb2   : > { %v1394_v31 = vsel %vm319_vm5, 1.0, %v1147_v29  ;;  %vm431_vm9 = vcmp.ge.f32.partialorder %v1325_v0, %v1246_v24  ;;  %v532_v33 = vadd.bf16 %v516_v25, %v404_v22  ;;  %vm327_vm10 = vcmp.gt.f32.partialorder %v268_v18, %v1246_v24 }
  0xb3   : > { %626 = vmatprep.mubr.bf16.mxu1 %v539_v26  ;;  %vm328_vm11 = vcmp.gt.f32.partialorder %v273_v10, %v1244_v23  ;;  %v878_v30 = vsel %vm329_vm7, 1.0, %v1147_v29  ;;  %v538_v32 = vadd.bf16 %v522_v28, %v410_v27  ;;  %vm439_vm12 = vcmp.ge.f32.partialorder %v268_v18, %v1246_v24 }
  0xb4   : > { %vm440_vm13 = vcmp.ge.f32.partialorder %v273_v10, %v1244_v23  ;;  %v910_v35 = vsel %vm441_vm8, 1.0, %v1147_v29  ;;  %603 = vmatmul.mubr.bf16.gmra.mrb[4].mxu0 %v532_v33  ;;  %v407_v36 = vpack.c.bf16 %v1296_v49, %v1330_v1  ;;  %v519_v37 = vpack.c.bf16 %v1317_v62, %v896_v3 }
  0xb5   : > { %627 = vmatmul.mubr.bf16.vlgmr.msra.gmra.mrb[0].mxu1 %v538_v32  ;;  %vm326_vm14 = vcmp.gt.f32.partialorder %v268_v18, %v1244_v23  ;;  %v876_v39 = vsel %vm327_vm10, 1.0, %v1147_v29  ;;  %vm438_vm15 = vcmp.ge.f32.partialorder %v268_v18, %v1244_v23  ;;  %vm332_vm0 = vcmp.gt.f32.partialorder %v283_v34, %v1244_v23  ;;  %v293_v50 = vpop.permute.xlu1 %292  ;;  %v288_v56 = vpop.permute.xlu0 %287 }
  0xb6   : > { %v908_v40 = vsel %vm439_vm12, 1.0, %v1147_v29  ;;  %v535_v41 = vadd.bf16 %v519_v37, %v407_v36  ;;  %vm333_vm1 = vcmp.gt.f32.partialorder %v283_v34, %v1246_v24  ;;  %vm444_vm2 = vcmp.ge.f32.partialorder %v283_v34, %v1244_v23 }
  0xb7   : > { %v899_v42 = vsel %vm430_vm6, 1.0, %v1147_v29  ;;  %v900_v43 = vsel %vm431_vm9, 1.0, %v1147_v29  ;;  %v877_v44 = vsel %vm328_vm11, 1.0, %v1147_v29  ;;  %vm445_vm3 = vcmp.ge.f32.partialorder %v283_v34, %v1246_v24 }
  0xb8   : > { %v909_v45 = vsel %vm440_vm13, 1.0, %v1147_v29  ;;  %v875_v46 = vsel %vm326_vm14, 1.0, %v1147_v29  ;;  %v907_v47 = vsel %vm438_vm15, 1.0, %v1147_v29  ;;  %610 = vmatprep.mubr.bf16.mxu0 %v535_v41  ;;  %v881_v49 = vsel %vm332_vm0, 1.0, %v1147_v29 }
  0xb9   : > { %v882_v51 = vsel %vm333_vm1, 1.0, %v1147_v29  ;;  %v913_v52 = vsel %vm444_vm2, 1.0, %v1147_v29  ;;  %v413_v53 = vpack.c.bf16 %v878_v30, %v876_v39  ;;  %v525_v54 = vpack.c.bf16 %v910_v35, %v908_v40 }
  0xba   : > { %v914_v55 = vsel %vm445_vm3, 1.0, %v1147_v29  ;;  %vm330_vm4 = vcmp.gt.f32.partialorder %v278_v38, %v1244_v23  ;;  %vm331_vm5 = vcmp.gt.f32.partialorder %v278_v38, %v1246_v24  ;;  %vm443_vm6 = vcmp.ge.f32.partialorder %v278_v38, %v1246_v24 }
  0xbb   : > { %vm442_vm7 = vcmp.ge.f32.partialorder %v278_v38, %v1244_v23  ;;  %v541_v57 = vadd.bf16 %v525_v54, %v413_v53  ;;  %vm337_vm8 = vcmp.gt.f32.partialorder %v293_v50, %v1246_v24  ;;  %vm449_vm9 = vcmp.ge.f32.partialorder %v293_v50, %v1246_v24 }
  0xbc   : > { %v406_v58 = vpack.c.bf16 %v1293_v48, %v1322_v63  ;;  %v518_v59 = vpack.c.bf16 %v1312_v61, %v1335_v2  ;;  %v412_v60 = vpack.c.bf16 %v877_v44, %v875_v46  ;;  %v524_v62 = vpack.c.bf16 %v909_v45, %v907_v47 }
  0xbd   : > { %v880_v0 = vsel %vm331_vm5, 1.0, %v1147_v29  ;;  %v912_v1 = vsel %vm443_vm6, 1.0, %v1147_v29  ;;  %634 = vmatprep.mubr.bf16.mxu1 %v541_v57  ;;  %vm335_vm10 = vcmp.gt.f32.partialorder %v288_v56, %v1246_v24  ;;  %vm447_vm11 = vcmp.ge.f32.partialorder %v288_v56, %v1246_v24 }
  0xbe   : > { %v879_v3 = vsel %vm330_vm4, 1.0, %v1147_v29  ;;  %v911_v48 = vsel %vm442_vm7, 1.0, %v1147_v29  ;;  %v534_v63 = vadd.bf16 %v518_v59, %v406_v58  ;;  %v540_v4 = vadd.bf16 %v524_v62, %v412_v60 }
  0xbf   : > { %v886_v61 = vsel %vm337_vm8, 1.0, %v1147_v29  ;;  %v918_v2 = vsel %vm449_vm9, 1.0, %v1147_v29  ;;  %v409_v5 = vpack.c.bf16 %v1368_v14, %v1394_v31  ;;  %v521_v6 = vpack.c.bf16 %v1375_v19, %v900_v43 }
  0xc0   : > { %611 = vmatmul.mubr.bf16.gmra.mrb[8].mxu0 %v534_v63  ;;  %635 = vmatmul.mubr.bf16.gmra.mrb[4].mxu1 %v540_v4  ;;  %v884_v24 = vsel %vm335_vm10, 1.0, %v1147_v29  ;;  %v916_v7 = vsel %vm447_vm11, 1.0, %v1147_v29  ;;  %v415_v8 = vpack.c.bf16 %v882_v51, %v880_v0  ;;  %v527_v10 = vpack.c.bf16 %v914_v55, %v912_v1 }
  0xc1   : > { %v537_v11 = vadd.bf16 %v521_v6, %v409_v5  ;;  %v408_v12 = vpack.c.bf16 %v1354_v9, %v1385_v21  ;;  %v520_v16 = vpack.c.bf16 %v1371_v15, %v899_v42  ;;  %v414_v17 = vpack.c.bf16 %v881_v49, %v879_v3 }
  0xc2   : > { %v543_v13 = vadd.bf16 %v527_v10, %v415_v8  ;;  %v526_v18 = vpack.c.bf16 %v913_v52, %v911_v48  ;;  %vm336_vm12 = vcmp.gt.f32.partialorder %v293_v50, %v1244_v23  ;;  %v417_v14 = vpack.c.bf16 %v886_v61, %v884_v24 }
  0xc3   : > { %618 = vmatprep.mubr.bf16.mxu0 %v537_v11  ;;  %v529_v19 = vpack.c.bf16 %v918_v2, %v916_v7  ;;  %vm448_vm13 = vcmp.ge.f32.partialorder %v293_v50, %v1244_v23  ;;  %vm334_vm14 = vcmp.gt.f32.partialorder %v288_v56, %v1244_v23  ;;  %vm446_vm15 = vcmp.ge.f32.partialorder %v288_v56, %v1244_v23 }
  0xc4   : > { %642 = vmatprep.mubr.bf16.mxu1 %v543_v13  ;;  %v885_v20 = vsel %vm336_vm12, 1.0, %v1147_v29  ;;  %v536_v9 = vadd.bf16 %v520_v16, %v408_v12  ;;  %v542_v21 = vadd.bf16 %v526_v18, %v414_v17  ;;  %v917_v15 = vsel %vm448_vm13, 1.0, %v1147_v29 }
  0xc5   : > { %v883_v22 = vsel %vm334_vm14, 1.0, %v1147_v29  ;;  %v915_v25 = vsel %vm446_vm15, 1.0, %v1147_v29  ;;  %v545_v26 = vadd.bf16 %v529_v19, %v417_v14  ;;  %vm181_vm0 = vcmask 7168  }
  0xc6   : > { %v416_v27 = vpack.c.bf16 %v885_v20, %v883_v22  ;;  %v528_v28 = vpack.c.bf16 %v917_v15, %v915_v25  ;;  %182 = vst.msk [vmem:[#allocation2] sm:$0xff] %vm181_vm0, %v1147_v29  ;;  %183 = vst.msk [vmem:[#allocation2 + $0x8] sm:$0xff] %vm181_vm0, %v1147_v29 }
  0xc7   : > { %184 = vst.msk [vmem:[#allocation2 + $0x10] sm:$0xff] %vm181_vm0, %v1147_v29  ;;  %185 = vst.msk [vmem:[#allocation2 + $0x18] sm:$0xff] %vm181_vm0, %v1147_v29 }
  0xc8   : > { %619 = vmatmul.mubr.bf16.gmra.mrb[12].mxu0 %v536_v9  ;;  %643 = vmatmul.mubr.bf16.gmra.mrb[8].mxu1 %v542_v21  ;;  %v544_v31 = vadd.bf16 %v528_v28, %v416_v27  ;;  %186 = vst.msk [vmem:[#allocation2 + $0x20] sm:$0xff] %vm181_vm0, %v1147_v29  ;;  %187 = vst.msk [vmem:[#allocation2 + $0x28] sm:$0xff] %vm181_vm0, %v1147_v29 }
  0xc9   : > { %650 = vmatprep.mubr.bf16.mxu1 %v545_v26  ;;  %188 = vst.msk [vmem:[#allocation2 + $0x30] sm:$0xff] %vm181_vm0, %v1147_v29  ;;  %189 = vst.msk [vmem:[#allocation2 + $0x38] sm:$0xff] %vm181_vm0, %v1147_v29 }
  0xca   : > { %190 = vst.msk [vmem:[#allocation2 + $0x40] sm:$0xff] %vm181_vm0, %v1147_v29  ;;  %191 = vst.msk [vmem:[#allocation2 + $0x48] sm:$0xff] %vm181_vm0, %v1147_v29 }
  0xcb   : > { %192 = vst.msk [vmem:[#allocation2 + $0x50] sm:$0xff] %vm181_vm0, %v1147_v29  ;;  %193 = vst.msk [vmem:[#allocation2 + $0x58] sm:$0xff] %vm181_vm0, %v1147_v29 }
  0xcc   : > { %194 = vst.msk [vmem:[#allocation2 + $0x60] sm:$0xff] %vm181_vm0, %v1147_v29  ;;  %195 = vst.msk [vmem:[#allocation2 + $0x68] sm:$0xff] %vm181_vm0, %v1147_v29 }
  0xcd   : > { %196 = vst.msk [vmem:[#allocation2 + $0x70] sm:$0xff] %vm181_vm0, %v1147_v29  ;;  %197 = vst.msk [vmem:[#allocation2 + $0x78] sm:$0xff] %vm181_vm0, %v1147_v29  ;;  %v546_v33 = vld [vmem:[#allocation2] sm:$0xff]  ;;  %v547_v35 = vld [vmem:[#allocation2 + $0x8] sm:$0xff] }
  0xce   : > { %v548_v42 = vld [vmem:[#allocation2 + $0x10] sm:$0xff]  ;;  %v549_v50 = vld [vmem:[#allocation2 + $0x18] sm:$0xff] }
  0xcf   : > { %v550_v0 = vld [vmem:[#allocation2 + $0x20] sm:$0xff]  ;;  %v551_v5 = vld [vmem:[#allocation2 + $0x28] sm:$0xff] }
  0xd0   : > { %651 = vmatmul.mubr.bf16.gmra.mrb[12].mxu1 %v544_v31  ;;  %v552_v25 = vld [vmem:[#allocation2 + $0x30] sm:$0xff] }
  0xd1   : > { %v554_v29 = vld [vmem:[#allocation2 + $0x40] sm:$0xff]  ;;  %v555_v54 = vld [vmem:[#allocation2 + $0x48] sm:$0xff] }
  0xd2   : > { %v556_v3 = vld [vmem:[#allocation2 + $0x50] sm:$0xff]  ;;  %v557_v24 = vld [vmem:[#allocation2 + $0x58] sm:$0xff] }
  0xd3   : > { %v558_v27 = vld [vmem:[#allocation2 + $0x60] sm:$0xff] }
 0x17c   : > { %v939_v23 = vpop.f32.mrb[0].mxu0 }
 0x17d   : > { %v940_v34 = vpop.f32.mrb[1].mxu0 }
 0x17e   : > { %v941_v30 = vadd.f32 %v940_v34, %v939_v23  ;;  %v942_v32 = vpop.f32.mrb[2].mxu0 }
 0x17f   : > { %v943_v36 = vpop.f32.mrb[3].mxu0 }
 0x180   : > { %v659_v37 = vadd.f32 %v941_v30, %v546_v33  ;;  %v944_v38 = vadd.f32 %v943_v36, %v942_v32  ;;  %v553_v32 = vld [vmem:[#allocation2 + $0x38] sm:$0xff]  ;;  %v559_v36 = vld [vmem:[#allocation2 + $0x68] sm:$0xff] }
 0x182   : > { %676 = vst.msk [vmem:[#allocation2] sm:$0xff] %vm181_vm0, %v659_v37  ;;  %v660_v39 = vadd.f32 %v944_v38, %v547_v35 }
 0x184   : > { %677 = vst.msk [vmem:[#allocation2 + $0x8] sm:$0xff] %vm181_vm0, %v660_v39 }
 0x187   : > { %v945_v40 = vpop.f32.mrb[4].mxu0 }
 0x188   : > { %v963_v41 = vpop.f32.mrb[0].mxu1  ;;  %v946_v43 = vpop.f32.mrb[5].mxu0 }
 0x189   : > { %v947_v44 = vadd.f32 %v946_v43, %v945_v40  ;;  %v964_v45 = vpop.f32.mrb[1].mxu1  ;;  %v948_v46 = vpop.f32.mrb[6].mxu0  ;;  %v695_v16 = vld [vmem:[#allocation2] sm:$0xff] }
 0x18a   : > { %v965_v47 = vadd.f32 %v964_v45, %v963_v41  ;;  %v966_v49 = vpop.f32.mrb[2].mxu1  ;;  %v949_v51 = vpop.f32.mrb[7].mxu0  ;;  %v711_v15 = vsel %vm181_vm0, %v695_v16, 0.0 }
 0x18b   : > { %v661_v52 = vadd.f32 %v947_v44, %v548_v42  ;;  %v950_v53 = vadd.f32 %v949_v51, %v948_v46  ;;  %v967_v55 = vpop.f32.mrb[3].mxu1  ;;  %v696_v8 = vld [vmem:[#allocation2 + $0x8] sm:$0xff]  ;;  %v560_v51 = vld [vmem:[#allocation2 + $0x70] sm:$0xff] }
 0x18c   : > { %v667_v56 = vadd.f32 %v965_v47, %v554_v29  ;;  %v968_v57 = vadd.f32 %v967_v55, %v966_v49  ;;  %v712_v19 = vsel %vm181_vm0, %v696_v8, 0.0 }
 0x18d   : > { %678 = vst.msk [vmem:[#allocation2 + $0x10] sm:$0xff] %vm181_vm0, %v661_v52  ;;  %v662_v58 = vadd.f32 %v950_v53, %v549_v50  ;;  %v713_v31 = vadd.f32 %v712_v19, %v711_v15 }
 0x18e   : > { %684 = vst.msk [vmem:[#allocation2 + $0x40] sm:$0xff] %vm181_vm0, %v667_v56  ;;  %v668_v59 = vadd.f32 %v968_v57, %v555_v54  ;;  %v561_v57 = vld [vmem:[#allocation2 + $0x78] sm:$0xff] }
 0x18f   : > { %679 = vst.msk [vmem:[#allocation2 + $0x18] sm:$0xff] %vm181_vm0, %v662_v58 }
 0x190   : > { %685 = vst.msk [vmem:[#allocation2 + $0x48] sm:$0xff] %vm181_vm0, %v668_v59 }
 0x193   : > { %v951_v60 = vpop.f32.mrb[8].mxu0  ;;  %v969_v62 = vpop.f32.mrb[4].mxu1 }
 0x194   : > { %v952_v1 = vpop.f32.mrb[9].mxu0  ;;  %v970_v48 = vpop.f32.mrb[5].mxu1  ;;  %v697_v17 = vld [vmem:[#allocation2 + $0x10] sm:$0xff] }
 0x195   : > { %v953_v63 = vadd.f32 %v952_v1, %v951_v60  ;;  %v971_v4 = vadd.f32 %v970_v48, %v969_v62  ;;  %v954_v61 = vpop.f32.mrb[10].mxu0  ;;  %v972_v2 = vpop.f32.mrb[6].mxu1  ;;  %v714_v22 = vsel %vm181_vm0, %v697_v17, 0.0 }
 0x196   : > { %v955_v6 = vpop.f32.mrb[11].mxu0  ;;  %v973_v7 = vpop.f32.mrb[7].mxu1  ;;  %v698_v21 = vld [vmem:[#allocation2 + $0x18] sm:$0xff]  ;;  %v715_v38 = vadd.f32 %v714_v22, %v713_v31 }
 0x197   : > { %v663_v10 = vadd.f32 %v953_v63, %v550_v0  ;;  %v669_v11 = vadd.f32 %v971_v4, %v556_v3  ;;  %v956_v12 = vadd.f32 %v955_v6, %v954_v61  ;;  %v974_v13 = vadd.f32 %v973_v7, %v972_v2  ;;  %v703_v63 = vld [vmem:[#allocation2 + $0x40] sm:$0xff]  ;;  %v704_v2 = vld [vmem:[#allocation2 + $0x48] sm:$0xff] }
 0x198   : > { %v716_v39 = vsel %vm181_vm0, %v698_v21, 0.0  ;;  %v726_v6 = vsel %vm181_vm0, %v703_v63, 0.0  ;;  %v728_v8 = vsel %vm181_vm0, %v704_v2, 0.0 }
 0x199   : > { %680 = vst.msk [vmem:[#allocation2 + $0x20] sm:$0xff] %vm181_vm0, %v663_v10  ;;  %686 = vst.msk [vmem:[#allocation2 + $0x50] sm:$0xff] %vm181_vm0, %v669_v11  ;;  %v664_v18 = vadd.f32 %v956_v12, %v551_v5  ;;  %v670_v14 = vadd.f32 %v974_v13, %v557_v24  ;;  %v717_v49 = vadd.f32 %v716_v39, %v715_v38 }
 0x19b   : > { %681 = vst.msk [vmem:[#allocation2 + $0x28] sm:$0xff] %vm181_vm0, %v664_v18  ;;  %687 = vst.msk [vmem:[#allocation2 + $0x58] sm:$0xff] %vm181_vm0, %v670_v14  ;;  %v957_v20 = vpop.f32.mrb[12].mxu0  ;;  %v975_v9 = vpop.f32.mrb[8].mxu1 }
 0x19c   : > { %v958_v26 = vpop.f32.mrb[13].mxu0  ;;  %v976_v28 = vpop.f32.mrb[9].mxu1 }
 0x19d   : > { %v959_v23 = vadd.f32 %v958_v26, %v957_v20  ;;  %v977_v33 = vadd.f32 %v976_v28, %v975_v9  ;;  %v960_v34 = vpop.f32.mrb[14].mxu0  ;;  %v978_v30 = vpop.f32.mrb[10].mxu1 }
 0x19e   : > { %v961_v35 = vpop.f32.mrb[15].mxu0  ;;  %v979_v37 = vpop.f32.mrb[11].mxu1 }
 0x19f   : > { %v665_v40 = vadd.f32 %v959_v23, %v552_v25  ;;  %v671_v41 = vadd.f32 %v977_v33, %v558_v27  ;;  %v962_v42 = vadd.f32 %v961_v35, %v960_v34  ;;  %v980_v43 = vadd.f32 %v979_v37, %v978_v30 }
 0x1a0   : > { %v699_v44 = vld [vmem:[#allocation2 + $0x20] sm:$0xff]  ;;  %v705_v24 = vld [vmem:[#allocation2 + $0x50] sm:$0xff] }
 0x1a1   : > { %682 = vst.msk [vmem:[#allocation2 + $0x30] sm:$0xff] %vm181_vm0, %v665_v40  ;;  %688 = vst.msk [vmem:[#allocation2 + $0x60] sm:$0xff] %vm181_vm0, %v671_v41  ;;  %v666_v29 = vadd.f32 %v962_v42, %v553_v32  ;;  %v672_v45 = vadd.f32 %v980_v43, %v559_v36  ;;  %v718_v46 = vsel %vm181_vm0, %v699_v44, 0.0  ;;  %v730_v12 = vsel %vm181_vm0, %v705_v24, 0.0 }
 0x1a2   : > { %v700_v47 = vld [vmem:[#allocation2 + $0x28] sm:$0xff]  ;;  %v719_v53 = vadd.f32 %v718_v46, %v717_v49  ;;  %v706_v10 = vld [vmem:[#allocation2 + $0x58] sm:$0xff] }
 0x1a3   : > { %683 = vst.msk [vmem:[#allocation2 + $0x38] sm:$0xff] %vm181_vm0, %v666_v29  ;;  %689 = vst.msk [vmem:[#allocation2 + $0x68] sm:$0xff] %vm181_vm0, %v672_v45  ;;  %v981_v50 = vpop.f32.mrb[12].mxu1  ;;  %v720_v56 = vsel %vm181_vm0, %v700_v47, 0.0  ;;  %v732_v17 = vsel %vm181_vm0, %v706_v10, 0.0 }
 0x1a4   : > { %v982_v52 = vpop.f32.mrb[13].mxu1  ;;  %v721_v0 = vadd.f32 %v720_v56, %v719_v53 }
 0x1a5   : > { %v983_v54 = vadd.f32 %v982_v52, %v981_v50  ;;  %v984_v55 = vpop.f32.mrb[14].mxu1 }
 0x1a6   : > { %v985_v58 = vpop.f32.mrb[15].mxu1 }
 0x1a7   : > { %v673_v59 = vadd.f32 %v983_v54, %v560_v51  ;;  %v986_v60 = vadd.f32 %v985_v58, %v984_v55 }
 0x1a8   : > { %v701_v62 = vld [vmem:[#allocation2 + $0x30] sm:$0xff]  ;;  %v707_v13 = vld [vmem:[#allocation2 + $0x60] sm:$0xff] }
 0x1a9   : > { %690 = vst.msk [vmem:[#allocation2 + $0x70] sm:$0xff] %vm181_vm0, %v673_v59  ;;  %v674_v1 = vadd.f32 %v986_v60, %v561_v57  ;;  %v722_v3 = vsel %vm181_vm0, %v701_v62, 0.0  ;;  %v734_v19 = vsel %vm181_vm0, %v707_v13, 0.0 }
 0x1aa   : > { %v702_v48 = vld [vmem:[#allocation2 + $0x38] sm:$0xff]  ;;  %v723_v4 = vadd.f32 %v722_v3, %v721_v0  ;;  %v708_v18 = vld [vmem:[#allocation2 + $0x68] sm:$0xff] }
 0x1ab   : > { %691 = vst.msk [vmem:[#allocation2 + $0x78] sm:$0xff] %vm181_vm0, %v674_v1  ;;  %v724_v61 = vsel %vm181_vm0, %v702_v48, 0.0  ;;  %v736_v21 = vsel %vm181_vm0, %v708_v18, 0.0 }
 0x1ac   : > { %v725_v5 = vadd.f32 %v724_v61, %v723_v4 }
 0x1ae   : > { %v727_v7 = vadd.f32 %v726_v6, %v725_v5 }
 0x1b0   : > { %v729_v11 = vadd.f32 %v728_v8, %v727_v7  ;;  %v709_v20 = vld [vmem:[#allocation2 + $0x70] sm:$0xff] }
 0x1b1   : > { %v738_v25 = vsel %vm181_vm0, %v709_v20, 0.0 }
 0x1b2   : > { %v731_v16 = vadd.f32 %v730_v12, %v729_v11  ;;  %v710_v15 = vld [vmem:[#allocation2 + $0x78] sm:$0xff] }
 0x1b3   : > { %v740_v27 = vsel %vm181_vm0, %v710_v15, 0.0 }
 0x1b4   : > { %v733_v14 = vadd.f32 %v732_v17, %v731_v16 }
 0x1b6   : > { %v735_v9 = vadd.f32 %v734_v19, %v733_v14 }
 0x1b8   : > { %v737_v22 = vadd.f32 %v736_v21, %v735_v9 }
 0x1ba   : > { %v739_v26 = vadd.f32 %v738_v25, %v737_v22 }
 0x1bc   : > { %v741_v28 = vadd.f32 %v740_v27, %v739_v26 }
 0x1be   : > { %742 = vadd.xlane.f32.xlu0 %v741_v28 }
 0x24b   : > { %v743_v31 = vpop.xlane.xlu0 %742 }
 0x24c   : > { %v744_v23 = vrot.slane %v743_v31, 4 }
 0x24e   : > { %v745_v33 = vadd.f32 %v744_v23, %v743_v31 }
 0x250   : > { %v746_v34 = vrot.slane %v745_v33, 2 }
 0x252   : > { %v747_v30 = vadd.f32 %v746_v34, %v745_v33 }
 0x254   : > { %v748_v32 = vrot.slane %v747_v30, 1 }
 0x256   : > { %v749_v35 = vadd.f32 %v748_v32, %v747_v30 }
 0x258   : > { %1003 = vpush %v749_v35 }
 0x289   : > { %s1004_s7 = spop %1003 }
 0x28a   : > { %v751_v36 = vstv %s1004_s7 }
 0x28b   : > { %752 = vst [vmem:[%s163_s4] sm:$0xff] %v751_v36 }
 0x28c   : > { %1078 = shalt.err (!%p1075_p5)
}
 0x28d   : > { %s1079_s25 = scalar_lea.hbm %s1542_s16, 128  ;;  %s1083_s28 = scalar_lea.hbm %s1589_s2, 256 }
 0x28e   : > { %p1080_p6 = scmp.ne.s32.totalorder %s1542_s16, %s1079_s25  ;;  %p1084_p10 = scmp.lt.u32.totalorder %s1542_s16, %s1589_s2 }
 0x28f   : > { %p1085_p11 = scmp.lt.u32.totalorder %s1083_s28, %s1079_s25  ;;  %p1087_p13 = scmp.lt.u32.totalorder %s1079_s25, %s1542_s16 }
 0x290   : > { %p1081_p7 = pnand %p1080_p6, %p1204_p4 }
 0x291   : > { %p1086_p12 = por %p1085_p11, %p1084_p10 }
 0x292   : > { %p1082_p9 = pneg %p1081_p7 }
 0x293   : > { %p1088_p0 = por %p1087_p13, %p1086_p12 }
 0x295   : > { %p1089_p1 = pnand %p1088_p0, %p1082_p9 }
 0x297   : > { %1092 = shalt.err (!%p1089_p1)
}
 0x298   : > { %1005 = dma.vmem_to_hbm [thread:$0]  (%p1204_p4), %s1537_s5, 128, %s1542_s16, %s754_s18  }
 0x299 PF: > { %p1011_p2 = scmp.ge.s32.totalorder %s1143_s14, 2  ;;  %s779_s3 = sand.u32 1, %s1123_s9  }
 0x29a   : > { %s780_s4 = scalar_lea.sflag [#allocation4], %s779_s3 }
 0x29b   : > { %p1008_p3 = pnand %p1011_p2, %p1211_p8 }
 0x29d   : > { %1118 = dma.done.wait (!%p1008_p3), %s780_s4, 128  }
 0x29e   : > { %1120 = vsyncadd (!%p1008_p3), %s780_s4, 4294967168  ;;  %s15_s14 = sadd.s32 1, %s1143_s14   ;;  %s1592_s9 = smov %s1127_s10 }
 0x29f   : > { %p12_p5 = scmp.ge.s32.totalorder %s15_s14, 4   ;;  %s1593_s10 = smov %s1131_s11 }
 0x2a0   : > { %s1594_s11 = smov %s1217_s22  ;;  %s1595_s12 = smov %s1139_s13 }
 0x2a1   : > { %s1596_s13 = smov %s1598_s17  ;;  %14 = sbr.rel (!%p12_p5) target bundleno = 4 (0x4), region = 74 }
 0x2a8   :  { %785 = vsyncpa [#allocation4], 1 }
 0x2a9   :  { %787 = vsyncpa [#allocation4 + $0x1], 1 }

</bundles_post_ra>
